<compile_context>
chip_gen: v7x
topology: tpu7x:2x2x1
jax: 0.10.0
libtpu: 0.0.40
codegen_flags: <defaults>
</compile_context>

<pallas_src>
import jax
import jax.numpy as jnp
from jax import lax
from jax.experimental import pallas as pl
from jax.experimental.pallas import tpu as pltpu

EPS_IN = 1e-5   # nn.InstanceNorm2d default eps


# ------------------------------- fused kernel --------------------------------

def _make_conv_bn_relu_kernel(E, act, ln, gelu_approx, matmul_dtype):
    inv_e = 1.0 / float(E)

    def body(x, w, bias, o_ref):
        # x: (Cin, E), w: (Cout, Cin) -> y: (Cout, E)   (E on the lane axis)
        if matmul_dtype != jnp.float32:
            x = x.astype(matmul_dtype)
            w = w.astype(matmul_dtype)
        y = jnp.dot(w, x, preferred_element_type=jnp.float32)
        if bias is not None:               # only when ln=False (norm cancels bias)
            y = y + bias                   # (Cout, 1) broadcast over lanes
        if ln:
            # One-pass per-(b, c) statistics over E (biased var, torch default).
            s1 = jnp.sum(y, axis=1, keepdims=True)          # (Cout, 1)
            s2 = jnp.sum(y * y, axis=1, keepdims=True)      # (Cout, 1)
            mean = s1 * inv_e
            var = jnp.maximum(s2 * inv_e - mean * mean, 0.0)  # clamp cancellation
            y = (y - mean) * lax.rsqrt(var + EPS_IN)          # rsqrt -> EUP slot
        if act == 'gelu':
            y = jax.nn.gelu(y, approximate=gelu_approx)       # tanh form -> EUP
        # (module applies no activation for act != 'gelu')
        o_ref[...] = y.astype(o_ref.dtype)

    if ln:
        def kernel(x_ref, w_ref, o_ref):
            body(x_ref[...], w_ref[...], None, o_ref)
    else:
        def kernel(x_ref, w_ref, b_ref, o_ref):
            body(x_ref[...], w_ref[...], b_ref[...], o_ref)
    return kernel


# --------------------------------- wrapper -----------------------------------

def conv_bn_relu(x_nchw, w, b, *, act='gelu', ln=True,
                 gelu_approx=True, use_bf16_matmul=False):
    """Fused ConvBNReLU forward.

    x_nchw : (B, Cin, E, 1)  — PyTorch edge-tensor layout
    w      : (Cout, Cin)     — MeshConv 1x1 weight (Conv2d weight (Cout,Cin,1,1) squeezed)
    b      : (Cout,)         — MeshConv bias
    returns: (B, Cout, E, 1)
    """
    B, Cin, E, one = x_nchw.shape
    assert one == 1
    Cout, Cin_w = w.shape
    assert Cin_w == Cin

    # Only the trailing size-1 dim is touched on the wrapper side (no transposes).
    x3 = x_nchw[..., 0]                                   # (B, Cin, E)

    kernel = _make_conv_bn_relu_kernel(
        E, act, ln, gelu_approx,
        jnp.bfloat16 if use_bf16_matmul else jnp.float32)

    in_specs = [
        pl.BlockSpec((None, Cin, E), lambda bi: (bi, 0, 0)),   # x_b  : (Cin, E)
        pl.BlockSpec((Cout, Cin), lambda bi: (0, 0)),          # w    : (Cout, Cin)
    ]
    args = [x3, w]
    if not ln:
        in_specs.append(pl.BlockSpec((Cout, 1), lambda bi: (0, 0)))
        args.append(b.reshape(Cout, 1).astype(jnp.float32))

    # VMEM budget from the actual per-step footprint (x + out double-buffered,
    # weight + intermediates + headroom), clamped to v7x physical VMEM (64 MiB).
    block_bytes = 4 * (Cin * E + Cout * E + Cout * Cin + Cout)
    vmem_limit = int(min(64 * 1024 * 1024, max(4 * 1024 * 1024, 6 * block_bytes)))

    out3 = pl.pallas_call(
        kernel,
        out_shape=jax.ShapeDtypeStruct((B, Cout, E), jnp.float32),
        grid=(B,),
        in_specs=in_specs,
        out_specs=pl.BlockSpec((None, Cout, E), lambda bi: (bi, 0, 0)),
        compiler_params=pltpu.CompilerParams(
            dimension_semantics=("parallel",),      # per-batch blocks are independent
            vmem_limit_bytes=vmem_limit),
    )(*args)

    return out3[..., None]                                 # (B, Cout, E, 1)


# ---------------------------- pure-JAX reference ------------------------------

def conv_bn_relu_ref(x_nchw, w, b, *, act='gelu', ln=True):
    x = x_nchw[..., 0].astype(jnp.float32)                 # (B, Cin, E)
    y = jnp.einsum('oc,bce->boe', w, x,
                   preferred_element_type=jnp.float32) + b[None, :, None]
    if ln:
        mean = jnp.mean(y, axis=2, keepdims=True)
        var = jnp.mean((y - mean) ** 2, axis=2, keepdims=True)
        y = (y - mean) * lax.rsqrt(var + EPS_IN)
    if act == 'gelu':
        y = jax.nn.gelu(y, approximate=False)              # torch F.gelu default (erf)
    return y[..., None]


# ------------------------------------ main ------------------------------------

if __name__ == "__main__":
    B, Cin, Cout, E = 2, 16, 128, 128     # E multiple of 128 -> lane-dense blocks

    key = jax.random.PRNGKey(0)
    kx, kw, kb = jax.random.split(key, 3)
    x = jax.random.normal(kx, (B, Cin, E, 1), jnp.float32)       # torch (B, Cin, E, 1)
    std = (2.0 / (Cin + Cout)) ** 0.5                            # xavier_normal, 1x1 conv
    w = std * jax.random.normal(kw, (Cout, Cin), jnp.float32)    # Conv2d weight squeezed
    b = jnp.zeros((Cout,), jnp.float32)                          # init.constant_(bias, 0)

    # Main path: MeshConv(1x1 approx) + InstanceNorm + GELU, f32 operands.
    out = jax.block_until_ready(conv_bn_relu(x, w, b, act='gelu', ln=True))
    assert out.shape == (B, Cout, E, 1)
    assert bool(jnp.all(jnp.isfinite(out)))
    ref = conv_bn_relu_ref(x, w, b, act='gelu', ln=True)
    max_err = float(jnp.max(jnp.abs(out - ref)))
    assert max_err < 2e-2, f"gelu/ln mismatch vs reference: {max_err}"

    # ln=False path keeps the conv bias (and no activation for act != 'gelu').
    b2 = 0.1 * jax.random.normal(kb, (Cout,), jnp.float32)
    out2 = jax.block_until_ready(conv_bn_relu(x, w, b2, act='none', ln=False))
    ref2 = conv_bn_relu_ref(x, w, b2, act='none', ln=False)
    max_err2 = float(jnp.max(jnp.abs(out2 - ref2)))
    assert max_err2 < 1e-4, f"bias/ln=False mismatch vs reference: {max_err2}"

    print("KERNEL_OK")
</pallas_src>

<mosaic_0001>
module attributes {stable_mosaic.version = 11 : i64} {
  func.func @kernel(%arg0: i32, %arg1: memref<1x16x128xf32, #tpu.memory_space<vmem>>, %arg2: memref<128x16xf32, #tpu.memory_space<vmem>>, %arg3: memref<1x128x128xf32, #tpu.memory_space<vmem>>) attributes {dimension_semantics = [#tpu.dimension_semantics<parallel>], iteration_bounds = array<i64: 2>, scalar_prefetch = 0 : i64, scratch_operands = 0 : i64, tpu.core_type = #tpu.core_type<tc>, window_params = [{transform_indices = @transform_0, window_bounds = array<i64: 1, 16, 128>}, {pipeline_mode = #tpu.pipeline_mode<synchronous>, transform_indices = @transform_1, window_bounds = array<i64: 128, 16>}, {transform_indices = @transform_2, window_bounds = array<i64: 1, 128, 128>}]} {
    %c0 = arith.constant 0 : index
    %c0_0 = arith.constant 0 : index
    %c0_1 = arith.constant 0 : index
    %0 = vector.load %arg1[%c0, %c0_0, %c0_1] : memref<1x16x128xf32, #tpu.memory_space<vmem>>, vector<1x16x128xf32>
    %1 = vector.shape_cast %0 : vector<1x16x128xf32> to vector<16x128xf32>
    %c0_2 = arith.constant 0 : index
    %c0_3 = arith.constant 0 : index
    %2 = vector.load %arg2[%c0_2, %c0_3] : memref<128x16xf32, #tpu.memory_space<vmem>>, vector<128x16xf32>
    %cst = arith.constant dense<0.000000e+00> : vector<128x128xf32>
    %3 = tpu.matmul %2, %1, %cst {dimension_numbers = #tpu.dot_dimension_numbers<[1], [0], [0], [1], [0, 0, 1, 1], [], []>} : vector<128x16xf32>, vector<16x128xf32>, vector<128x128xf32> -> vector<128x128xf32>
    %cst_4 = arith.constant dense<0.000000e+00> : vector<128xf32>
    %4 = vector.multi_reduction <add>, %3, %cst_4 [1] : vector<128x128xf32> to vector<128xf32>
    %5 = vector.shape_cast %4 : vector<128xf32> to vector<128x1xf32>
    %6 = arith.mulf %3, %3 : vector<128x128xf32>
    %cst_5 = arith.constant dense<0.000000e+00> : vector<128xf32>
    %7 = vector.multi_reduction <add>, %6, %cst_5 [1] : vector<128x128xf32> to vector<128xf32>
    %8 = vector.shape_cast %7 : vector<128xf32> to vector<128x1xf32>
    %cst_6 = arith.constant 7.812500e-03 : f32
    %9 = vector.broadcast %cst_6 : f32 to vector<128x1xf32>
    %10 = arith.mulf %5, %9 : vector<128x1xf32>
    %cst_7 = arith.constant 7.812500e-03 : f32
    %11 = vector.broadcast %cst_7 : f32 to vector<128x1xf32>
    %12 = arith.mulf %8, %11 : vector<128x1xf32>
    %13 = arith.mulf %10, %10 : vector<128x1xf32>
    %14 = arith.subf %12, %13 : vector<128x1xf32>
    %cst_8 = arith.constant 0.000000e+00 : f32
    %15 = vector.broadcast %cst_8 : f32 to vector<128x1xf32>
    %16 = arith.maximumf %14, %15 : vector<128x1xf32>
    %17 = vector.broadcast %10 : vector<128x1xf32> to vector<128x128xf32>
    %18 = arith.subf %3, %17 : vector<128x128xf32>
    %cst_9 = arith.constant 9.99999974E-6 : f32
    %19 = vector.broadcast %cst_9 : f32 to vector<128x1xf32>
    %20 = arith.addf %16, %19 : vector<128x1xf32>
    %21 = math.rsqrt %20 : vector<128x1xf32>
    %22 = vector.broadcast %21 : vector<128x1xf32> to vector<128x128xf32>
    %23 = arith.mulf %18, %22 : vector<128x128xf32>
    %24 = arith.mulf %23, %23 : vector<128x128xf32>
    %25 = arith.mulf %23, %24 : vector<128x128xf32>
    %cst_10 = arith.constant 4.471500e-02 : f32
    %26 = vector.broadcast %cst_10 : f32 to vector<128x128xf32>
    %27 = arith.mulf %26, %25 : vector<128x128xf32>
    %28 = arith.addf %23, %27 : vector<128x128xf32>
    %cst_11 = arith.constant 0.797884583 : f32
    %29 = vector.broadcast %cst_11 : f32 to vector<128x128xf32>
    %30 = arith.mulf %29, %28 : vector<128x128xf32>
    %31 = math.tanh %30 : vector<128x128xf32>
    %cst_12 = arith.constant 1.000000e+00 : f32
    %32 = vector.broadcast %cst_12 : f32 to vector<128x128xf32>
    %33 = arith.addf %32, %31 : vector<128x128xf32>
    %cst_13 = arith.constant 5.000000e-01 : f32
    %34 = vector.broadcast %cst_13 : f32 to vector<128x128xf32>
    %35 = arith.mulf %34, %33 : vector<128x128xf32>
    %36 = arith.mulf %23, %35 : vector<128x128xf32>
    %c0_14 = arith.constant 0 : index
    %c0_15 = arith.constant 0 : index
    %c0_16 = arith.constant 0 : index
    %37 = vector.load %arg3[%c0_14, %c0_15, %c0_16] : memref<1x128x128xf32, #tpu.memory_space<vmem>>, vector<1x128x128xf32>
    %38 = vector.shape_cast %37 : vector<1x128x128xf32> to vector<128x128xf32>
    %39 = vector.shape_cast %36 : vector<128x128xf32> to vector<1x128x128xf32>
    tpu.vector_store %arg3[%c0_14, %c0_15, %c0_16], %39 {strides = array<i32>} : memref<1x128x128xf32, #tpu.memory_space<vmem>>, vector<1x128x128xf32>,
    return
  }
  func.func @transform_0(%arg0: i32) -> (i32, i32, i32) {
    %c0_i32 = arith.constant 0 : i32
    %c0_i32_0 = arith.constant 0 : i32
    %c0_i32_1 = arith.constant 0 : i32
    return %arg0, %c0_i32, %c0_i32_0 : i32, i32, i32
  }
  func.func @transform_1(%arg0: i32) -> (i32, i32) {
    %c0_i32 = arith.constant 0 : i32
    %c0_i32_0 = arith.constant 0 : i32
    %c0_i32_1 = arith.constant 0 : i32
    return %c0_i32, %c0_i32_0 : i32, i32
  }
  func.func @transform_2(%arg0: i32) -> (i32, i32, i32) {
    %c0_i32 = arith.constant 0 : i32
    %c0_i32_0 = arith.constant 0 : i32
    %c0_i32_1 = arith.constant 0 : i32
    return %arg0, %c0_i32, %c0_i32_0 : i32, i32, i32
  }
}

</mosaic_0001>

<bundles_post_ra>
// kernel: tpu_custom_call.1
= control target key start
LH: loop header
LB: loop body
LE: loop exit
PB: predicated region body
PF: predicated region fallthrough
CT: control target
= control target key end

     0   :  { %7 = vsyncpa [#allocation3], 0  ;;  %s1526_s0 = inlined_call_operand.vmem [shape: f32[2,16,128], index: 0, kind: input, shape index: {}]   ;;  %s1527_s1 = inlined_call_operand.vmem [shape: f32[128,16], index: 1, kind: input, shape index: {}]   ;;  %s1528_s2 = inlined_call_operand.hbm [shape: f32[2,128,128], index: 2, kind: output, shape index: {}]  }
   0x1   :  { %9 = vsyncpa [#allocation3 + $0x1], 0  ;;  %s1083_s9 = smov 0   ;;  %s1085_s10 = smov 0  }
   0x2   :  { %s1087_s11 = smov 0   ;;  %s1089_s12 = smov 0  }
   0x3 LB: > { %s1104_s13 = sadd.s32 4294967295, %s1063_s12   ;;  %s814_s14 = sadd.s32 4294967294, %s1063_s12   ;;  %s1063_s12 = sphi %s1089_s12, %s1534_s12   ;;  %s1059_s11 = sphi %s1087_s11, %s1533_s11   ;;  %s1055_s10 = sphi %s1085_s10, %s1532_s10   ;;  %s1051_s9 = sphi %s1083_s9, %s1531_s9  }
   0x4   : > { %s1108_s15 = sadd.s32 1, %s1063_s12   ;;  %s69_s16 = sadd.s32 1, %s1059_s11 }
   0x5   : > { %s66_s17 = ssub.s32 %s1063_s12, %s1108_s15  ;;  %p79_p0 = scmp.ne.s32.totalorder %s1059_s11, %s1055_s10 }
   0x6   : > { %p67_p1 = scmp.eq.s32.totalorder %s66_s17, 0  ;;  %p80_p2 = scmp.eq.s32.totalorder %s1104_s13, 1 }
   0x7   : > { %p85_p3 = scmp.ne.s32.totalorder %s1055_s10, %s1051_s9  ;;  %p86_p4 = scmp.eq.s32.totalorder %s814_s14, 1 }
   0x8   : > { %s1119_s18 = scalar_select %p67_p1, %s1059_s11, %s69_s16  }
   0x9   : > { %p1121_p5 = por %p80_p2, %p79_p0  ;;  %p1125_p6 = por %p86_p4, %p85_p3 }
   0xa   : > { %p817_p7 = scmp.ge.s32.totalorder %s1063_s12, 1  ;;  %p115_p8 = scmp.lt.s32.totalorder %s1063_s12, 3 }
   0xc   : > { %p116_p9 = pnand %p817_p7, %p115_p8 }
   0xd   : > { %p137_p10 = scmp.lt.s32.totalorder (!%p116_p9), %s1104_s13, 1  ;;  %v144_v0 = vld [vmem:[%s1527_s1] sm:$0xff] (!%p116_p9)  ;;  %vm160_vm0 = vcmask (!%p116_p9), 130048   ;;  %v145_v5 = vld [vmem:[%s1527_s1 + $0x8] sm:$0xff] (!%p116_p9)  ;;  %v146_v7 = vld [vmem:[%s1527_s1 + $0x10] sm:$0xff] (!%p116_p9)  ;;  %s134_s17 = sand.u32 (!%p116_p9), 1, %s1055_s10  }
   0xe   : > { %119 = sbr.rel (%p116_p9) target bundleno = 518 (0x206), region = 28  ;;  %v152_v1 = vld [vmem:[%s1527_s1 + $0x40] sm:$0xff] (!%p116_p9)  ;;  %866 = vmatprep.mubr.msk.f32.mxu0 (!%p116_p9), %vm160_vm0, %v144_v0  ;;  %v153_v6 = vld [vmem:[%s1527_s1 + $0x48] sm:$0xff] (!%p116_p9)  ;;  %v154_v8 = vld [vmem:[%s1527_s1 + $0x50] sm:$0xff] (!%p116_p9)  ;;  %s1367_s21 = sshll.u32 (!%p116_p9), %s134_s17, 7 }
   0xf   : > { %878 = vmatprep.mubr.msk.f32.mxu1 (!%p116_p9), %vm160_vm0, %v152_v1  ;;  %v147_v9 = vld [vmem:[%s1527_s1 + $0x18] sm:$0xff] (!%p116_p9)  ;;  %v148_v11 = vld [vmem:[%s1527_s1 + $0x20] sm:$0xff] (!%p116_p9)  ;;  %v149_v13 = vld [vmem:[%s1527_s1 + $0x28] sm:$0xff] (!%p116_p9)  ;;  %s1385_s22 = scalar_lea.vmem (!%p116_p9), [#allocation2], %s1367_s21  ;;  %s843_s23 = sshll.u32 (!%p116_p9), %s1104_s13, 11 }
  0x10   : > { %v155_v10 = vld [vmem:[%s1527_s1 + $0x58] sm:$0xff] (!%p116_p9)  ;;  %v156_v12 = vld [vmem:[%s1527_s1 + $0x60] sm:$0xff] (!%p116_p9)  ;;  %v157_v14 = vld [vmem:[%s1527_s1 + $0x68] sm:$0xff] (!%p116_p9)  ;;  %s752_s24 = sshll.u32 (!%p116_p9), %s1385_s22, 4  ;;  %s1477_s27 = scalar_lea.hbm (!%p116_p9), %s1528_s2, %s843_s23  ;;  %s1479_s24 = int_to_ptr.vmem [resolvable:$true] %s752_s24 }
  0x11   : > { %v150_v15 = vld [vmem:[%s1527_s1 + $0x30] sm:$0xff] (!%p116_p9)  ;;  %v151_v17 = vld [vmem:[%s1527_s1 + $0x38] sm:$0xff] (!%p116_p9)  ;;  %s1001_s28 = scalar_lea.vmem (!%p116_p9), %s1479_s24, 2048 }
  0x12   : > { %v158_v16 = vld [vmem:[%s1527_s1 + $0x70] sm:$0xff] (!%p116_p9)  ;;  %v159_v18 = vld [vmem:[%s1527_s1 + $0x78] sm:$0xff] (!%p116_p9)  ;;  %p1002_p11 = scmp.ne.s32.totalorder (!%p116_p9), %s1479_s24, %s1001_s28 }
  0x14   : > { %p1003_p12 = pnand (!%p116_p9), %p1002_p11, %p1121_p5 }
  0x15   : > { %s138_s25 = scalar_select %p137_p10, %s1104_s13, 1 }
  0x16   : > { %s1485_s13 = scalar_lea.sflag [#allocation3], %s134_s17  ;;  %p1004_p13 = pneg %p1003_p12 }
  0x17   : > { %s842_s26 = sshll.u32 %s138_s25, 4 }
  0x18   : > { %s141_s29 = scalar_lea.vmem %s1526_s0, %s842_s26 }
  0x19   : > { %v142_v2 = vld [vmem:[%s141_s29] sm:$0xff]  ;;  %v143_v3 = vld [vmem:[%s141_s29 + $0x8] sm:$0xff]  ;;  %s1065_s29 = smov [#allocation2]  }
  0x1a   : > { %v890_v4 = vpack.c.bf16 %v143_v3, %v142_v2  ;;  %s1005_s30 = sshll.u32 %s1065_s29, 4  ;;  %s1006_s30 = int_to_ptr.vmem [resolvable:$false] %s1005_s30 }
  0x1b   : > { %s1007_s3 = scalar_lea.vmem %s1006_s30, 4096  ;;  %p1008_p0 = scmp.lt.s32.totalorder %s1479_s24, %s1006_s30 }
  0x1c   : > { %891 = vmatprep.subr.bf16.mxu0 %v890_v4  ;;  %894 = vmatprep.subr.bf16.mxu1 %v890_v4  ;;  %p1009_p1 = scmp.lt.s32.totalorder %s1007_s3, %s1001_s28 }
  0x1d   : > { %893 = vmatpush3.bf16.msra.mxu0 %v890_v4  ;;  %895 = vmatpush3.bf16.msra.mxu1 %v890_v4 }
  0x1e   : > { %p1010_p2 = por %p1009_p1, %p1008_p0 }
  0x20   : > { %867 = vmatmul.mubr.msk.f32.vlgmr.msra.gmra.mrb[0].mxu0 %vm160_vm0, %v145_v5  ;;  %879 = vmatmul.mubr.msk.f32.vlgmr.msra.gmra.mrb[0].mxu1 %vm160_vm0, %v153_v6  ;;  %p1011_p3 = pnand %p1010_p2, %p1004_p13 }
  0x21   : > { %869 = vmatprep.mubr.msk.f32.mxu0 %vm160_vm0, %v146_v7  ;;  %881 = vmatprep.mubr.msk.f32.mxu1 %vm160_vm0, %v154_v8 }
  0x24   : > { %870 = vmatmul.mubr.msk.f32.gmra.mrb[2].mxu0 %vm160_vm0, %v147_v9  ;;  %882 = vmatmul.mubr.msk.f32.gmra.mrb[2].mxu1 %vm160_vm0, %v155_v10 }
  0x25   : > { %872 = vmatprep.mubr.msk.f32.mxu0 %vm160_vm0, %v148_v11  ;;  %884 = vmatprep.mubr.msk.f32.mxu1 %vm160_vm0, %v156_v12 }
  0x28   : > { %873 = vmatmul.mubr.msk.f32.gmra.mrb[4].mxu0 %vm160_vm0, %v149_v13  ;;  %885 = vmatmul.mubr.msk.f32.gmra.mrb[4].mxu1 %vm160_vm0, %v157_v14 }
  0x29   : > { %875 = vmatprep.mubr.msk.f32.mxu0 %vm160_vm0, %v150_v15  ;;  %887 = vmatprep.mubr.msk.f32.mxu1 %vm160_vm0, %v158_v16 }
  0x2c   : > { %876 = vmatmul.mubr.msk.f32.gmra.mrb[6].mxu0 %vm160_vm0, %v151_v17  ;;  %888 = vmatmul.mubr.msk.f32.gmra.mrb[6].mxu1 %vm160_vm0, %v159_v18 }
  0xf3   : > { %v1200_v19 = vpop.f32.mrb[0].mxu0  ;;  %v1202_v20 = vpop.f32.mrb[0].mxu1 }
  0xf4   : > { %372 = vadd.xlane.f32.xlu1 %v1202_v20  ;;  %v1205_v21 = vpop.f32.mrb[1].mxu1  ;;  %356 = vadd.xlane.f32.xlu0 %v1200_v19  ;;  %v1208_v22 = vpop.f32.mrb[1].mxu0  ;;  %v387_v23 = vmul.f32 %v1200_v19, %v1200_v19  ;;  %v395_v28 = vmul.f32 %v1202_v20, %v1202_v20 }
  0xf5   : > { %v386_v33 = vmul.f32 %v1208_v22, %v1208_v22  ;;  %v394_v38 = vmul.f32 %v1205_v21, %v1205_v21 }
  0xf7   : > { %v1212_v24 = vpop.f32.mrb[2].mxu0  ;;  %v1214_v25 = vpop.f32.mrb[2].mxu1 }
  0xf8   : > { %404 = vadd.xlane.f32.xlu1 %v387_v23  ;;  %354 = vadd.xlane.f32.xlu0 %v1208_v22  ;;  %v1217_v26 = vpop.f32.mrb[3].mxu0  ;;  %v1219_v27 = vpop.f32.mrb[3].mxu1  ;;  %v389_v39 = vmul.f32 %v1212_v24, %v1212_v24  ;;  %v397_v41 = vmul.f32 %v1214_v25, %v1214_v25 }
  0xf9   : > { %v388_v40 = vmul.f32 %v1217_v26, %v1217_v26  ;;  %v396_v42 = vmul.f32 %v1219_v27, %v1219_v27 }
  0xfb   : > { %v1223_v29 = vpop.f32.mrb[4].mxu0  ;;  %v1225_v30 = vpop.f32.mrb[4].mxu1 }
  0xfc   : > { %420 = vadd.xlane.f32.xlu1 %v395_v28  ;;  %370 = vadd.xlane.f32.xlu0 %v1205_v21  ;;  %v1228_v31 = vpop.f32.mrb[5].mxu0  ;;  %v1230_v32 = vpop.f32.mrb[5].mxu1  ;;  %v391_v43 = vmul.f32 %v1223_v29, %v1223_v29  ;;  %v399_v45 = vmul.f32 %v1225_v30, %v1225_v30 }
  0xfd   : > { %v390_v44 = vmul.f32 %v1228_v31, %v1228_v31  ;;  %v398_v46 = vmul.f32 %v1230_v32, %v1230_v32 }
  0xff   : > { %v1234_v34 = vpop.f32.mrb[6].mxu0  ;;  %v1236_v35 = vpop.f32.mrb[6].mxu1 }
 0x100   : > { %402 = vadd.xlane.f32.xlu0 %v386_v33  ;;  %360 = vadd.xlane.f32.xlu1 %v1212_v24  ;;  %v1239_v36 = vpop.f32.mrb[7].mxu0  ;;  %v1241_v37 = vpop.f32.mrb[7].mxu1  ;;  %v393_v47 = vmul.f32 %v1234_v34, %v1234_v34  ;;  %v401_v49 = vmul.f32 %v1236_v35, %v1236_v35 }
 0x101   : > { %v392_v48 = vmul.f32 %v1239_v36, %v1239_v36  ;;  %v400_v50 = vmul.f32 %v1241_v37, %v1241_v37 }
 0x104   : > { %418 = vadd.xlane.f32.xlu0 %v394_v38  ;;  %376 = vadd.xlane.f32.xlu1 %v1214_v25 }
 0x108   : > { %374 = vadd.xlane.f32.xlu0 %v1219_v27  ;;  %358 = vadd.xlane.f32.xlu1 %v1217_v26 }
 0x10c   : > { %408 = vadd.xlane.f32.xlu1 %v389_v39  ;;  %406 = vadd.xlane.f32.xlu0 %v388_v40 }
 0x110   : > { %424 = vadd.xlane.f32.xlu1 %v397_v41  ;;  %422 = vadd.xlane.f32.xlu0 %v396_v42 }
 0x114   : > { %364 = vadd.xlane.f32.xlu1 %v1223_v29  ;;  %362 = vadd.xlane.f32.xlu0 %v1228_v31 }
 0x118   : > { %380 = vadd.xlane.f32.xlu1 %v1225_v30  ;;  %378 = vadd.xlane.f32.xlu0 %v1230_v32 }
 0x11c   : > { %412 = vadd.xlane.f32.xlu1 %v391_v43  ;;  %410 = vadd.xlane.f32.xlu0 %v390_v44 }
 0x120   : > { %428 = vadd.xlane.f32.xlu1 %v399_v45  ;;  %426 = vadd.xlane.f32.xlu0 %v398_v46 }
 0x124   : > { %368 = vadd.xlane.f32.xlu1 %v1234_v34  ;;  %366 = vadd.xlane.f32.xlu0 %v1239_v36 }
 0x128   : > { %384 = vadd.xlane.f32.xlu1 %v1236_v35  ;;  %382 = vadd.xlane.f32.xlu0 %v1241_v37 }
 0x12c   : > { %416 = vadd.xlane.f32.xlu1 %v393_v47  ;;  %414 = vadd.xlane.f32.xlu0 %v392_v48 }
 0x130   : > { %432 = vadd.xlane.f32.xlu1 %v401_v49  ;;  %430 = vadd.xlane.f32.xlu0 %v400_v50 }
 0x181   : > { %v373_v51 = vpop.xlane.xlu1 %372  ;;  %v357_v52 = vpop.xlane.xlu0 %356 }
 0x182   : > { %v435_v53 = vmul.f32 0.0078125, %v357_v52  ;;  %v443_v56 = vmul.f32 0.0078125, %v373_v51 }
 0x184   : > { %v467_v57 = vmul.f32 %v435_v53, %v435_v53  ;;  %v475_v63 = vmul.f32 %v443_v56, %v443_v56  ;;  %v515_v40 = vsub.f32 %v1200_v19, %v435_v53  ;;  %v523_v19 = vsub.f32 %v1202_v20, %v443_v56 }
 0x185   : > { %v405_v54 = vpop.xlane.xlu1 %404  ;;  %v355_v55 = vpop.xlane.xlu0 %354 }
 0x186   : > { %v451_v58 = vmul.f32 0.0078125, %v405_v54  ;;  %v1280_v60 = vmul.f32 0.0078125, %v355_v55 }
 0x188   : > { %v483_v59 = vsub.f32 %v451_v58, %v467_v57  ;;  %v466_v4 = vmul.f32 %v1280_v60, %v1280_v60 }
 0x189   : > { %v421_v61 = vpop.xlane.xlu1 %420  ;;  %v371_v62 = vpop.xlane.xlu0 %370 }
 0x18a   : > { %v499_v0 = vmax.f32 %v483_v59, 0.0  ;;  %v459_v1 = vmul.f32 0.0078125, %v421_v61  ;;  %v1284_v8 = vmul.f32 0.0078125, %v371_v62 }
 0x18c   : > { %v531_v2 = vadd.f32 1e-05, %v499_v0  ;;  %v491_v3 = vsub.f32 %v459_v1, %v475_v63  ;;  %v474_v14 = vmul.f32 %v1284_v8, %v1284_v8 }
 0x18d   : > { %v403_v5 = vpop.xlane.xlu0 %402  ;;  %v361_v6 = vpop.xlane.xlu1 %360 }
 0x18e   : > { %937 = vrsqrt.f32 %v531_v2  ;;  %v507_v7 = vmax.f32 %v491_v3, 0.0  ;;  %v450_v9 = vmul.f32 0.0078125, %v403_v5  ;;  %v1288_v23 = vmul.f32 0.0078125, %v361_v6 }
 0x18f   : > { %v514_v3 = vsub.f32 %v1208_v22, %v1280_v60 }
 0x190   : > { %v539_v10 = vadd.f32 1e-05, %v507_v7  ;;  %v482_v11 = vsub.f32 %v450_v9, %v466_v4  ;;  %v469_v44 = vmul.f32 %v1288_v23, %v1288_v23 }
 0x191   : > { %v419_v12 = vpop.xlane.xlu0 %418  ;;  %v377_v13 = vpop.xlane.xlu1 %376 }
 0x192   : > { %939 = vrsqrt.f32 %v539_v10  ;;  %v498_v15 = vmax.f32 %v482_v11, 0.0  ;;  %v458_v16 = vmul.f32 0.0078125, %v419_v12  ;;  %v1297_v45 = vmul.f32 0.0078125, %v377_v13 }
 0x194   : > { %v530_v17 = vadd.f32 1e-05, %v498_v15  ;;  %v490_v18 = vsub.f32 %v458_v16, %v474_v14  ;;  %v477_v59 = vmul.f32 %v1297_v45, %v1297_v45  ;;  %v522_v16 = vsub.f32 %v1205_v21, %v1284_v8 }
 0x195   : > { %v375_v28 = vpop.xlane.xlu0 %374  ;;  %v359_v33 = vpop.xlane.xlu1 %358 }
 0x196   : > { %941 = vrsqrt.f32 %v530_v17  ;;  %v506_v38 = vmax.f32 %v490_v18, 0.0  ;;  %v1290_v39 = vmul.f32 0.0078125, %v359_v33  ;;  %v1299_v46 = vmul.f32 0.0078125, %v375_v28 }
 0x198   : > { %v938_v41 = vpop.eup %937  ;;  %v538_v42 = vadd.f32 1e-05, %v506_v38  ;;  %v468_v49 = vmul.f32 %v1290_v39, %v1290_v39  ;;  %v476_v61 = vmul.f32 %v1299_v46, %v1299_v46 }
 0x199   : > { %v1293_v43 = vmul.f32 %v938_v41, %v515_v40  ;;  %v409_v47 = vpop.xlane.xlu1 %408  ;;  %v407_v48 = vpop.xlane.xlu0 %406 }
 0x19a   : > { %943 = vrsqrt.f32 %v538_v42  ;;  %v453_v50 = vmul.f32 0.0078125, %v409_v47  ;;  %v452_v51 = vmul.f32 0.0078125, %v407_v48 }
 0x19b   : > { %v579_v52 = vmul.f32 %v1293_v43, %v1293_v43 }
 0x19c   : > { %v940_v53 = vpop.eup %939  ;;  %v485_v54 = vsub.f32 %v453_v50, %v469_v44  ;;  %v484_v55 = vsub.f32 %v452_v51, %v468_v49 }
 0x19d   : > { %v595_v57 = vmul.f32 %v579_v52, %v1293_v43  ;;  %v1307_v58 = vmul.f32 %v940_v53, %v523_v19  ;;  %v425_v62 = vpop.xlane.xlu1 %424  ;;  %v423_v63 = vpop.xlane.xlu0 %422  ;;  %v517_v19 = vsub.f32 %v1212_v24, %v1288_v23  ;;  %v525_v23 = vsub.f32 %v1214_v25, %v1297_v45 }
 0x19e   : > { %v501_v0 = vmax.f32 %v485_v54, 0.0  ;;  %v500_v20 = vmax.f32 %v484_v55, 0.0  ;;  %v461_v56 = vmul.f32 0.0078125, %v425_v62  ;;  %v460_v1 = vmul.f32 0.0078125, %v423_v63 }
 0x19f   : > { %v611_v2 = vmul.f32 0.044715, %v595_v57  ;;  %v587_v4 = vmul.f32 %v1307_v58, %v1307_v58 }
 0x1a0   : > { %v942_v5 = vpop.eup %941  ;;  %v533_v6 = vadd.f32 1e-05, %v501_v0  ;;  %v532_v7 = vadd.f32 1e-05, %v500_v20  ;;  %v493_v9 = vsub.f32 %v461_v56, %v477_v59  ;;  %v492_v10 = vsub.f32 %v460_v1, %v476_v61 }
 0x1a1   : > { %v627_v11 = vadd.f32 %v611_v2, %v1293_v43  ;;  %v603_v12 = vmul.f32 %v587_v4, %v1307_v58  ;;  %v1319_v13 = vmul.f32 %v942_v5, %v514_v3  ;;  %v365_v14 = vpop.xlane.xlu1 %364  ;;  %v363_v15 = vpop.xlane.xlu0 %362  ;;  %v524_v1 = vsub.f32 %v1219_v27, %v1299_v46 }
 0x1a2   : > { %945 = vrsqrt.f32 %v533_v6  ;;  %v509_v22 = vmax.f32 %v493_v9, 0.0  ;;  %v508_v60 = vmax.f32 %v492_v10, 0.0  ;;  %v1329_v47 = vmul.f32 0.0078125, %v365_v14 }
 0x1a3   : > { %v643_v17 = vmul.f32 0.7978846, %v627_v11  ;;  %v619_v18 = vmul.f32 0.044715, %v603_v12  ;;  %v578_v28 = vmul.f32 %v1319_v13, %v1319_v13  ;;  %947 = vrsqrt.f32 %v532_v7 }
 0x1a4   : > { %v944_v33 = vpop.eup %943  ;;  %v541_v38 = vadd.f32 1e-05, %v509_v22  ;;  %v540_v40 = vadd.f32 1e-05, %v508_v60  ;;  %v1331_v48 = vmul.f32 0.0078125, %v363_v15  ;;  %v471_v59 = vmul.f32 %v1329_v47, %v1329_v47 }
 0x1a5   : > { %949 = vtanh.f32 %v643_v17  ;;  %v635_v41 = vadd.f32 %v619_v18, %v1307_v58  ;;  %v594_v42 = vmul.f32 %v578_v28, %v1319_v13  ;;  %v1327_v44 = vmul.f32 %v944_v33, %v522_v16  ;;  %v381_v21 = vpop.xlane.xlu1 %380  ;;  %v379_v8 = vpop.xlane.xlu0 %378 }
 0x1a6   : > { %951 = vrsqrt.f32 %v541_v38  ;;  %v1339_v54 = vmul.f32 0.0078125, %v381_v21  ;;  %v470_v61 = vmul.f32 %v1331_v48, %v1331_v48  ;;  %v1347_v20 = vmul.f32 0.0078125, %v379_v8 }
 0x1a7   : > { %v651_v49 = vmul.f32 0.7978846, %v635_v41  ;;  %v610_v50 = vmul.f32 0.044715, %v594_v42  ;;  %v586_v51 = vmul.f32 %v1327_v44, %v1327_v44  ;;  %953 = vrsqrt.f32 %v540_v40 }
 0x1a8   : > { %v516_v2 = vsub.f32 %v1217_v26, %v1290_v39  ;;  %v479_v25 = vmul.f32 %v1339_v54, %v1339_v54  ;;  %v478_v14 = vmul.f32 %v1347_v20, %v1347_v20 }
 0x1a9   : > { %955 = vtanh.f32 %v651_v49  ;;  %v626_v52 = vadd.f32 %v610_v50, %v1319_v13  ;;  %v602_v53 = vmul.f32 %v586_v51, %v1327_v44  ;;  %v413_v55 = vpop.xlane.xlu1 %412  ;;  %v411_v57 = vpop.xlane.xlu0 %410 }
 0x1aa   : > { %v455_v62 = vmul.f32 0.0078125, %v413_v55  ;;  %v454_v63 = vmul.f32 0.0078125, %v411_v57 }
 0x1ab   : > { %v642_v0 = vmul.f32 0.7978846, %v626_v52  ;;  %v618_v24 = vmul.f32 0.044715, %v602_v53 }
 0x1ac   : > { %v946_v56 = vpop.eup %945  ;;  %v487_v3 = vsub.f32 %v455_v62, %v471_v59  ;;  %v486_v4 = vsub.f32 %v454_v63, %v470_v61 }
 0x1ad   : > { %v948_v5 = vpop.eup %947  ;;  %957 = vtanh.f32 %v642_v0  ;;  %v634_v6 = vadd.f32 %v618_v24, %v1327_v44  ;;  %v1355_v7 = vmul.f32 %v946_v56, %v517_v19  ;;  %v429_v45 = vpop.xlane.xlu1 %428 }
 0x1ae   : > { %v427_v9 = vpop.xlane.xlu0 %426  ;;  %v1359_v10 = vmul.f32 %v948_v5, %v516_v2  ;;  %v503_v27 = vmax.f32 %v487_v3, 0.0  ;;  %v502_v46 = vmax.f32 %v486_v4, 0.0  ;;  %v463_v26 = vmul.f32 0.0078125, %v429_v45 }
 0x1af   : > { %v950_v39 = vpop.eup %949  ;;  %v650_v11 = vmul.f32 0.7978846, %v634_v6  ;;  %v581_v12 = vmul.f32 %v1355_v7, %v1355_v7  ;;  %v462_v15 = vmul.f32 0.0078125, %v427_v9 }
 0x1b0   : > { %v952_v16 = vpop.eup %951  ;;  %v675_v22 = vadd.f32 1.0, %v950_v39  ;;  %v580_v60 = vmul.f32 %v1359_v10, %v1359_v10  ;;  %v535_v17 = vadd.f32 1e-05, %v503_v27  ;;  %v534_v18 = vadd.f32 1e-05, %v502_v46 }
 0x1b1   : > { %v954_v28 = vpop.eup %953  ;;  %959 = vtanh.f32 %v650_v11  ;;  %v597_v33 = vmul.f32 %v581_v12, %v1355_v7  ;;  %v1372_v38 = vmul.f32 %v952_v16, %v525_v23  ;;  %v495_v40 = vsub.f32 %v463_v26, %v479_v25  ;;  %v369_v41 = vpop.xlane.xlu1 %368 }
 0x1b2   : > { %v367_v42 = vpop.xlane.xlu0 %366  ;;  %v691_v21 = vmul.f32 0.5, %v675_v22  ;;  %v596_v8 = vmul.f32 %v580_v60, %v1359_v10  ;;  %v1375_v49 = vmul.f32 %v954_v28, %v524_v1  ;;  %961 = vrsqrt.f32 %v535_v17 }
 0x1b3   : > { %v956_v50 = vpop.eup %955  ;;  %v613_v51 = vmul.f32 0.044715, %v597_v33  ;;  %v589_v19 = vmul.f32 %v1372_v38, %v1372_v38  ;;  %963 = vrsqrt.f32 %v534_v18  ;;  %v511_v52 = vmax.f32 %v495_v40, 0.0 }
 0x1b4   : > { %v707_v53 = vmul.f32 %v691_v21, %v1293_v43  ;;  %v683_v55 = vadd.f32 1.0, %v956_v50  ;;  %v612_v57 = vmul.f32 0.044715, %v596_v8  ;;  %v588_v59 = vmul.f32 %v1375_v49, %v1375_v49 }
 0x1b5   : > { %v629_v61 = vadd.f32 %v613_v51, %v1355_v7  ;;  %v605_v62 = vmul.f32 %v589_v19, %v1372_v38  ;;  %v543_v63 = vadd.f32 1e-05, %v511_v52  ;;  %v494_v0 = vsub.f32 %v462_v15, %v478_v14  ;;  %v385_v24 = vpop.xlane.xlu1 %384 }
 0x1b6   : > { %v383_v23 = vpop.xlane.xlu0 %382  ;;  %723 = vst [vmem:[%s1385_s22 + $0x8] sm:$0xff] %v707_v53  ;;  %v699_v56 = vmul.f32 0.5, %v683_v55  ;;  %v628_v43 = vadd.f32 %v612_v57, %v1359_v10  ;;  %v604_v1 = vmul.f32 %v588_v59, %v1375_v49  ;;  %v519_v46 = vsub.f32 %v1223_v29, %v1329_v47 }
 0x1b7   : > { %v958_v2 = vpop.eup %957  ;;  %v645_v3 = vmul.f32 0.7978846, %v629_v61  ;;  %v621_v4 = vmul.f32 0.044715, %v605_v62  ;;  %965 = vrsqrt.f32 %v543_v63  ;;  %v510_v5 = vmax.f32 %v494_v0, 0.0 }
 0x1b8   : > { %v715_v6 = vmul.f32 %v699_v56, %v1307_v58  ;;  %v674_v25 = vadd.f32 1.0, %v958_v2  ;;  %v644_v45 = vmul.f32 0.7978846, %v628_v43  ;;  %v620_v9 = vmul.f32 0.044715, %v604_v1 }
 0x1b9   : > { %967 = vtanh.f32 %v645_v3  ;;  %v637_v27 = vadd.f32 %v621_v4, %v1372_v38  ;;  %v542_v26 = vadd.f32 1e-05, %v510_v5  ;;  %v417_v39 = vpop.xlane.xlu1 %416  ;;  %v1396_v15 = vmul.f32 0.0078125, %v369_v41 }
 0x1ba   : > { %v415_v11 = vpop.xlane.xlu0 %414  ;;  %731 = vst [vmem:[%s1385_s22 + $0x48] sm:$0xff] %v715_v6  ;;  %v690_v12 = vmul.f32 0.5, %v674_v25  ;;  %969 = vtanh.f32 %v644_v45  ;;  %v636_v14 = vadd.f32 %v620_v9, %v1375_v49  ;;  %v1398_v22 = vmul.f32 0.0078125, %v367_v42 }
 0x1bb   : > { %v960_v58 = vpop.eup %959  ;;  %v653_v16 = vmul.f32 0.7978846, %v637_v27  ;;  %971 = vrsqrt.f32 %v542_v26  ;;  %v1400_v60 = vmul.f32 0.0078125, %v385_v24  ;;  %v518_v28 = vsub.f32 %v1228_v31, %v1331_v48 }
 0x1bc   : > { %v962_v17 = vpop.eup %961  ;;  %v706_v29 = vmul.f32 %v690_v12, %v1319_v13  ;;  %v682_v47 = vadd.f32 1.0, %v960_v58  ;;  %v652_v18 = vmul.f32 0.7978846, %v636_v14  ;;  %v1407_v41 = vmul.f32 0.0078125, %v383_v23 }
 0x1bd   : > { %v964_v33 = vpop.eup %963  ;;  %973 = vtanh.f32 %v653_v16  ;;  %v1405_v40 = vmul.f32 %v962_v17, %v519_v46  ;;  %v527_v42 = vsub.f32 %v1225_v30, %v1339_v54  ;;  %v433_v13 = vpop.xlane.xlu1 %432  ;;  %v473_v48 = vmul.f32 %v1396_v15, %v1396_v15 }
 0x1be   : > { %722 = vst [vmem:[%s1385_s22] sm:$0xff] %v706_v29  ;;  %v698_v21 = vmul.f32 0.5, %v682_v47  ;;  %975 = vtanh.f32 %v652_v18  ;;  %v1412_v8 = vmul.f32 %v964_v33, %v518_v28  ;;  %v431_v50 = vpop.xlane.xlu0 %430  ;;  %v472_v51 = vmul.f32 %v1398_v22, %v1398_v22 }
 0x1bf   : > { %v583_v31 = vmul.f32 %v1405_v40, %v1405_v40  ;;  %v481_v19 = vmul.f32 %v1400_v60, %v1400_v60  ;;  %v457_v54 = vmul.f32 0.0078125, %v417_v39  ;;  %v456_v53 = vmul.f32 0.0078125, %v415_v11 }
 0x1c0   : > { %v714_v52 = vmul.f32 %v698_v21, %v1327_v44  ;;  %v582_v30 = vmul.f32 %v1412_v8, %v1412_v8  ;;  %v480_v59 = vmul.f32 %v1407_v41, %v1407_v41  ;;  %v465_v61 = vmul.f32 0.0078125, %v433_v13 }
 0x1c1   : > { %v966_v55 = vpop.eup %965  ;;  %v599_v57 = vmul.f32 %v583_v31, %v1405_v40  ;;  %v464_v62 = vmul.f32 0.0078125, %v431_v50  ;;  %v489_v24 = vsub.f32 %v457_v54, %v473_v48  ;;  %v488_v44 = vsub.f32 %v456_v53, %v472_v51 }
 0x1c2   : > { %730 = vst [vmem:[%s1385_s22 + $0x40] sm:$0xff] %v714_v52  ;;  %v598_v63 = vmul.f32 %v582_v30, %v1412_v8  ;;  %v1430_v0 = vmul.f32 %v966_v55, %v527_v42  ;;  %v526_v56 = vsub.f32 %v1230_v32, %v1347_v20  ;;  %v497_v1 = vsub.f32 %v465_v61, %v481_v19 }
 0x1c3   : > { %v968_v23 = vpop.eup %967  ;;  %v615_v43 = vmul.f32 0.044715, %v599_v57  ;;  %v496_v2 = vsub.f32 %v464_v62, %v480_v59  ;;  %v505_v25 = vmax.f32 %v489_v24, 0.0  ;;  %v504_v46 = vmax.f32 %v488_v44, 0.0 }
 0x1c4   : > { %v970_v3 = vpop.eup %969  ;;  %v677_v4 = vadd.f32 1.0, %v968_v23  ;;  %v614_v5 = vmul.f32 0.044715, %v598_v63  ;;  %v591_v6 = vmul.f32 %v1430_v0, %v1430_v0  ;;  %v513_v26 = vmax.f32 %v497_v1, 0.0 }
 0x1c5   : > { %v972_v45 = vpop.eup %971  ;;  %v676_v9 = vadd.f32 1.0, %v970_v3  ;;  %v631_v27 = vadd.f32 %v615_v43, %v1405_v40  ;;  %v537_v16 = vadd.f32 1e-05, %v505_v25  ;;  %v512_v17 = vmax.f32 %v496_v2, 0.0 }
 0x1c6   : > { %v693_v39 = vmul.f32 0.5, %v677_v4  ;;  %v630_v11 = vadd.f32 %v614_v5, %v1412_v8  ;;  %v607_v32 = vmul.f32 %v591_v6, %v1430_v0  ;;  %v1439_v20 = vmul.f32 %v972_v45, %v526_v56 }
 0x1c7   : > { %v974_v12 = vpop.eup %973  ;;  %v692_v14 = vmul.f32 0.5, %v676_v9  ;;  %v647_v58 = vmul.f32 0.7978846, %v631_v27  ;;  %v536_v48 = vadd.f32 1e-05, %v504_v46  ;;  %v529_v56 = vsub.f32 %v1236_v35, %v1400_v60 }
 0x1c8   : > { %v976_v29 = vpop.eup %975  ;;  %v709_v47 = vmul.f32 %v693_v39, %v1355_v7  ;;  %v685_v18 = vadd.f32 1.0, %v974_v12  ;;  %v646_v28 = vmul.f32 0.7978846, %v630_v11  ;;  %v623_v33 = vmul.f32 0.044715, %v607_v32 }
 0x1c9   : > { %v708_v21 = vmul.f32 %v692_v14, %v1359_v10  ;;  %v684_v42 = vadd.f32 1.0, %v976_v29  ;;  %977 = vtanh.f32 %v647_v58  ;;  %v590_v13 = vmul.f32 %v1439_v20, %v1439_v20 }
 0x1ca   : > { %725 = vst [vmem:[%s1385_s22 + $0x18] sm:$0xff] %v709_v47  ;;  %v701_v50 = vmul.f32 0.5, %v685_v18  ;;  %979 = vtanh.f32 %v646_v28  ;;  %v639_v31 = vadd.f32 %v623_v33, %v1430_v0  ;;  %v545_v19 = vadd.f32 1e-05, %v513_v26 }
 0x1cb   : > { %724 = vst [vmem:[%s1385_s22 + $0x10] sm:$0xff] %v708_v21  ;;  %v700_v7 = vmul.f32 0.5, %v684_v42  ;;  %v606_v51 = vmul.f32 %v590_v13, %v1439_v20  ;;  %981 = vrsqrt.f32 %v537_v16  ;;  %v544_v30 = vadd.f32 1e-05, %v512_v17 }
 0x1cc   : > { %v717_v10 = vmul.f32 %v701_v50, %v1372_v38  ;;  %v655_v52 = vmul.f32 0.7978846, %v639_v31  ;;  %983 = vrsqrt.f32 %v536_v48  ;;  %v521_v38 = vsub.f32 %v1234_v34, %v1396_v15 }
 0x1cd   : > { %v716_v54 = vmul.f32 %v700_v7, %v1375_v49  ;;  %v622_v53 = vmul.f32 0.044715, %v606_v51  ;;  %985 = vrsqrt.f32 %v545_v19  ;;  %v520_v49 = vsub.f32 %v1239_v36, %v1398_v22 }
 0x1ce   : > { %733 = vst [vmem:[%s1385_s22 + $0x58] sm:$0xff] %v717_v10  ;;  %987 = vtanh.f32 %v655_v52  ;;  %v528_v34 = vsub.f32 %v1241_v37, %v1407_v41 }
 0x1cf   : > { %732 = vst [vmem:[%s1385_s22 + $0x50] sm:$0xff] %v716_v54  ;;  %v638_v55 = vadd.f32 %v622_v53, %v1439_v20  ;;  %989 = vrsqrt.f32 %v544_v30 }
 0x1d1   : > { %v654_v57 = vmul.f32 0.7978846, %v638_v55 }
 0x1d3   : > { %v978_v59 = vpop.eup %977  ;;  %991 = vtanh.f32 %v654_v57 }
 0x1d4   : > { %v980_v61 = vpop.eup %979  ;;  %v679_v62 = vadd.f32 1.0, %v978_v59 }
 0x1d5   : > { %v982_v63 = vpop.eup %981  ;;  %v678_v24 = vadd.f32 1.0, %v980_v61 }
 0x1d6   : > { %v984_v44 = vpop.eup %983  ;;  %v695_v23 = vmul.f32 0.5, %v679_v62  ;;  %v569_v43 = vmul.f32 %v982_v63, %v521_v38 }
 0x1d7   : > { %v986_v1 = vpop.eup %985  ;;  %v694_v2 = vmul.f32 0.5, %v678_v24  ;;  %v568_v3 = vmul.f32 %v984_v44, %v520_v49 }
 0x1d8   : > { %v988_v4 = vpop.eup %987  ;;  %v711_v5 = vmul.f32 %v695_v23, %v1405_v40  ;;  %v585_v15 = vmul.f32 %v569_v43, %v569_v43  ;;  %v577_v6 = vmul.f32 %v986_v1, %v529_v56 }
 0x1d9   : > { %v990_v36 = vpop.eup %989  ;;  %v710_v22 = vmul.f32 %v694_v2, %v1412_v8  ;;  %v687_v25 = vadd.f32 1.0, %v988_v4  ;;  %v584_v45 = vmul.f32 %v568_v3, %v568_v3 }
 0x1da   : > { %727 = vst [vmem:[%s1385_s22 + $0x28] sm:$0xff] %v711_v5  ;;  %v601_v35 = vmul.f32 %v585_v15, %v569_v43  ;;  %v593_v60 = vmul.f32 %v577_v6, %v577_v6  ;;  %v576_v9 = vmul.f32 %v990_v36, %v528_v34 }
 0x1db   : > { %726 = vst [vmem:[%s1385_s22 + $0x20] sm:$0xff] %v710_v22  ;;  %v703_v27 = vmul.f32 0.5, %v687_v25  ;;  %v600_v46 = vmul.f32 %v584_v45, %v568_v3 }
 0x1dc   : > { %v617_v26 = vmul.f32 0.044715, %v601_v35  ;;  %v609_v40 = vmul.f32 %v593_v60, %v577_v6  ;;  %v592_v39 = vmul.f32 %v576_v9, %v576_v9 }
 0x1dd   : > { %v992_v11 = vpop.eup %991  ;;  %v719_v37 = vmul.f32 %v703_v27, %v1430_v0  ;;  %v616_v41 = vmul.f32 0.044715, %v600_v46 }
 0x1de   : > { %v686_v32 = vadd.f32 1.0, %v992_v11  ;;  %v633_v8 = vadd.f32 %v617_v26, %v569_v43  ;;  %v625_v12 = vmul.f32 0.044715, %v609_v40  ;;  %v608_v14 = vmul.f32 %v592_v39, %v576_v9 }
 0x1df   : > { %735 = vst [vmem:[%s1385_s22 + $0x68] sm:$0xff] %v719_v37  ;;  %v632_v58 = vadd.f32 %v616_v41, %v568_v3 }
 0x1e0   : > { %v702_v16 = vmul.f32 0.5, %v686_v32  ;;  %v649_v17 = vmul.f32 0.7978846, %v633_v8  ;;  %v641_v29 = vadd.f32 %v625_v12, %v577_v6  ;;  %v624_v47 = vmul.f32 0.044715, %v608_v14 }
 0x1e1   : > { %v648_v18 = vmul.f32 0.7978846, %v632_v58 }
 0x1e2   : > { %v718_v28 = vmul.f32 %v702_v16, %v1439_v20  ;;  %993 = vtanh.f32 %v649_v17  ;;  %v657_v33 = vmul.f32 0.7978846, %v641_v29  ;;  %v640_v21 = vadd.f32 %v624_v47, %v576_v9 }
 0x1e3   : > { %995 = vtanh.f32 %v648_v18 }
 0x1e4   : > { %734 = vst [vmem:[%s1385_s22 + $0x60] sm:$0xff] %v718_v28  ;;  %997 = vtanh.f32 %v657_v33  ;;  %v656_v0 = vmul.f32 0.7978846, %v640_v21 }
 0x1e6   : > { %999 = vtanh.f32 %v656_v0 }
 0x1ec   : > { %v994_v42 = vpop.eup %993 }
 0x1ed   : > { %v996_v13 = vpop.eup %995  ;;  %v681_v50 = vadd.f32 1.0, %v994_v42 }
 0x1ee   : > { %v998_v31 = vpop.eup %997  ;;  %v680_v48 = vadd.f32 1.0, %v996_v13 }
 0x1ef   : > { %v697_v7 = vmul.f32 0.5, %v681_v50  ;;  %v689_v20 = vadd.f32 1.0, %v998_v31 }
 0x1f0   : > { %v1000_v51 = vpop.eup %999  ;;  %v696_v19 = vmul.f32 0.5, %v680_v48 }
 0x1f1   : > { %v713_v10 = vmul.f32 %v697_v7, %v569_v43  ;;  %v705_v52 = vmul.f32 0.5, %v689_v20  ;;  %v688_v30 = vadd.f32 1.0, %v1000_v51 }
 0x1f2   : > { %v712_v54 = vmul.f32 %v696_v19, %v568_v3 }
 0x1f3   : > { %729 = vst [vmem:[%s1385_s22 + $0x38] sm:$0xff] %v713_v10  ;;  %v721_v53 = vmul.f32 %v705_v52, %v577_v6  ;;  %v704_v55 = vmul.f32 0.5, %v688_v30 }
 0x1f4   : > { %728 = vst [vmem:[%s1385_s22 + $0x30] sm:$0xff] %v712_v54 }
 0x1f5   : > { %737 = vst [vmem:[%s1385_s22 + $0x78] sm:$0xff] %v721_v53  ;;  %v720_v57 = vmul.f32 %v704_v55, %v576_v9 }
 0x1f7   : > { %736 = vst [vmem:[%s1385_s22 + $0x70] sm:$0xff] %v720_v57 }
 0x1f8   : > { %1014 = shalt.err (!%p1011_p3)
}
 0x1f9   : > { %s1015_s4 = scalar_lea.hbm %s1477_s27, 2048  ;;  %s1019_s7 = scalar_lea.hbm %s1528_s2, 4096 }
 0x1fa   : > { %p1016_p4 = scmp.ne.s32.totalorder %s1477_s27, %s1015_s4  ;;  %p1020_p9 = scmp.lt.u32.totalorder %s1477_s27, %s1528_s2 }
 0x1fb   : > { %p1021_p10 = scmp.lt.u32.totalorder %s1019_s7, %s1015_s4  ;;  %p1023_p12 = scmp.lt.u32.totalorder %s1015_s4, %s1477_s27 }
 0x1fc   : > { %p1017_p7 = pnand %p1016_p4, %p1121_p5 }
 0x1fd   : > { %p1022_p11 = por %p1021_p10, %p1020_p9 }
 0x1fe   : > { %p1018_p8 = pneg %p1017_p7 }
 0x1ff   : > { %p1024_p13 = por %p1023_p12, %p1022_p11 }
 0x201   : > { %p1025_p0 = pnand %p1024_p13, %p1018_p8 }
 0x203   : > { %1028 = shalt.err (!%p1025_p0)
}
 0x204   : > { %s1066_s16 = smov 128   ;;  %s1067_s17 = smov 8  }
 0x205   : > { %896 = dma.vmem_to_hbm [thread:$0]  (%p1121_p5), %s1479_s24, 2048, %s1477_s27, %s1485_s13, %s1066_s16, %s1066_s16, %s1067_s17  }
 0x206 PF: > { %p902_p1 = scmp.ge.s32.totalorder %s1063_s12, 2  ;;  %s767_s21 = sand.u32 1, %s1051_s9  }
 0x207   : > { %s768_s22 = scalar_lea.sflag [#allocation3], %s767_s21 }
 0x208   : > { %p899_p2 = pnand %p902_p1, %p1125_p6 }
 0x20a   : > { %1046 = dma.done.wait (!%p899_p2), %s768_s22, 2048  }
 0x20b   : > { %1048 = vsyncadd (!%p899_p2), %s768_s22, 4294965248  ;;  %p12_p3 = scmp.ge.s32.totalorder %s1108_s15, 4   ;;  %s1531_s9 = smov %s1055_s10 }
 0x20c   : > { %s1532_s10 = smov %s1059_s11  ;;  %s1533_s11 = smov %s1119_s18 }
 0x20d   : > { %s1534_s12 = smov %s1108_s15  ;;  %14 = sbr.rel (!%p12_p3) target bundleno = 3 (0x3), region = 63 }
 0x214   :  { %773 = vsyncpa [#allocation3], 1 }
 0x215   :  { %775 = vsyncpa [#allocation3 + $0x1], 1 }

</bundles_post_ra>
